<compile_context>
chip_gen: v6e
topology: v6e:2x2x1
jax: 0.10.0
libtpu: 0.0.40
codegen_flags: <defaults>
</compile_context>

<pallas_src>
import jax
import jax.numpy as jnp
from jax import lax
from jax.experimental import pallas as pl
from jax.experimental.pallas import tpu as pltpu


def _mlp_kernel(x_ref, w1t_ref, b1w2_ref, b2_ref, o_ref):
    x = x_ref[...]          # (B, D)   VMEM
    w1t = w1t_ref[...]      # (D, H)   VMEM (pre-transposed weight)
    bw = b1w2_ref[...]      # (2, H)   VMEM: row 0 = b1, row 1 = w2
    b1 = bw[0:1, :]         # (1, H)
    w2 = bw[1:2, :]         # (1, H)
    b2 = b2_ref[0]          # scalar   SMEM

    # Layer 1: plain NN matmul on the MXU (no in-kernel transpose of w1).
    hidden = jnp.dot(x, w1t, preferred_element_type=jnp.float32) + b1   # (B, H)

    # Layer 2 (output width 1): contract over H so the result is a lane-dense
    # (1, B) tile with batch on lanes -> unmasked-friendly store path.
    out = lax.dot_general(
        w2, hidden,
        dimension_numbers=(((1,), (1,)), ((), ())),
        preferred_element_type=jnp.float32,
    ) + b2                                                               # (1, B)
    o_ref[...] = out.astype(o_ref.dtype)


def two_layer_network_forward(x, w1, b1, w2, b2):
    B, D = x.shape
    H = w1.shape[0]

    # One-time weight/layout prep (static parameters in real use).
    w1t = w1.T                                                    # (D, H)
    b1w2 = jnp.concatenate(
        [b1.reshape(1, H), w2.reshape(1, H)], axis=0)             # (2, H)
    b2 = b2.reshape(1).astype(jnp.float32)                        # (1,) SMEM scalar

    out_1b = pl.pallas_call(
        _mlp_kernel,
        out_shape=jax.ShapeDtypeStruct((1, B), jnp.float32),
        in_specs=[
            pl.BlockSpec(memory_space=pltpu.MemorySpace.VMEM),    # x     (B, D)
            pl.BlockSpec(memory_space=pltpu.MemorySpace.VMEM),    # w1t   (D, H)
            pl.BlockSpec(memory_space=pltpu.MemorySpace.VMEM),    # b1|w2 (2, H)
            pl.BlockSpec(memory_space=pltpu.MemorySpace.SMEM),    # b2    (1,)
        ],
        out_specs=pl.BlockSpec(memory_space=pltpu.MemorySpace.VMEM),
    )(x, w1t, b1w2, b2)

    # (1, B) -> (B, 1) is the same flat element order: free reshape.
    return out_1b.reshape(B, 1)


if __name__ == "__main__":
    # Shapes implied by the module: (batch, input_size) -> (batch, 1)
    batch, input_size, hidden_size = 8, 32, 64

    key = jax.random.PRNGKey(0)
    kx, k1, kb1, k2, kb2 = jax.random.split(key, 5)

    x = jax.random.normal(kx, (batch, input_size), dtype=jnp.float32)

    # PyTorch-style uniform(-1/sqrt(fan_in), 1/sqrt(fan_in)) init, with
    # PyTorch-native parameter shapes.
    bound1 = 1.0 / (float(input_size) ** 0.5)
    w1 = jax.random.uniform(k1, (hidden_size, input_size), jnp.float32,
                            -bound1, bound1)
    b1 = jax.random.uniform(kb1, (hidden_size,), jnp.float32, -bound1, bound1)
    bound2 = 1.0 / (float(hidden_size) ** 0.5)
    w2 = jax.random.uniform(k2, (1, hidden_size), jnp.float32, -bound2, bound2)
    b2 = jax.random.uniform(kb2, (1,), jnp.float32, -bound2, bound2)

    out = two_layer_network_forward(x, w1, b1, w2, b2)
    out = jax.block_until_ready(out)

    # Reference check in plain JAX (same math as the PyTorch forward).
    ref = (x @ w1.T + b1) @ w2.T + b2
    assert out.shape == (batch, 1)
    assert jnp.allclose(out, ref, atol=1e-4, rtol=1e-4)

    # TODO(synk): optimizer (SGD) and MSELoss from the module are training-time
    # state, not part of the forward pass, so they are not implemented here.
    print("KERNEL_OK")
</pallas_src>

<mosaic_0001>
module attributes {stable_mosaic.version = 11 : i64} {
  func.func @_mlp_kernel(%arg0: memref<8x32xf32, #tpu.memory_space<vmem>>, %arg1: memref<32x64xf32, #tpu.memory_space<vmem>>, %arg2: memref<2x64xf32, #tpu.memory_space<vmem>>, %arg3: memref<1xf32, #tpu.memory_space<smem>>, %arg4: memref<1x8xf32, #tpu.memory_space<vmem>>) attributes {dimension_semantics = [], scalar_prefetch = 0 : i64, scratch_operands = 0 : i64, tpu.core_type = #tpu.core_type<tc>} {
    %c0 = arith.constant 0 : index
    %c0_0 = arith.constant 0 : index
    %0 = vector.load %arg0[%c0, %c0_0] : memref<8x32xf32, #tpu.memory_space<vmem>>, vector<8x32xf32>
    %c0_1 = arith.constant 0 : index
    %c0_2 = arith.constant 0 : index
    %1 = vector.load %arg1[%c0_1, %c0_2] : memref<32x64xf32, #tpu.memory_space<vmem>>, vector<32x64xf32>
    %c0_3 = arith.constant 0 : index
    %c0_4 = arith.constant 0 : index
    %2 = vector.load %arg2[%c0_3, %c0_4] : memref<2x64xf32, #tpu.memory_space<vmem>>, vector<2x64xf32>
    %3 = vector.extract_strided_slice %2 {offsets = [0, 0], sizes = [1, 64], strides = [1, 1]} : vector<2x64xf32> to vector<1x64xf32>
    %4 = vector.extract_strided_slice %2 {offsets = [1, 0], sizes = [1, 64], strides = [1, 1]} : vector<2x64xf32> to vector<1x64xf32>
    %c0_5 = arith.constant 0 : index
    %5 = memref.load %arg3[%c0_5] : memref<1xf32, #tpu.memory_space<smem>>
    %cst = arith.constant dense<0.000000e+00> : vector<8x64xf32>
    %6 = tpu.matmul %0, %1, %cst {dimension_numbers = #tpu.dot_dimension_numbers<[1], [0], [0], [1], [0, 0, 1, 1], [], []>} : vector<8x32xf32>, vector<32x64xf32>, vector<8x64xf32> -> vector<8x64xf32>
    %7 = vector.broadcast %3 : vector<1x64xf32> to vector<8x64xf32>
    %8 = arith.addf %6, %7 : vector<8x64xf32>
    %cst_6 = arith.constant dense<0.000000e+00> : vector<1x8xf32>
    %9 = tpu.matmul %4, %8, %cst_6 {dimension_numbers = #tpu.dot_dimension_numbers<[1], [1], [0], [0], [0, 0, 1, 0], [], []>} : vector<1x64xf32>, vector<8x64xf32>, vector<1x8xf32> -> vector<1x8xf32>
    %10 = vector.broadcast %5 : f32 to vector<1x8xf32>
    %11 = arith.addf %9, %10 : vector<1x8xf32>
    %c0_7 = arith.constant 0 : index
    %c0_8 = arith.constant 0 : index
    %12 = vector.load %arg4[%c0_7, %c0_8] : memref<1x8xf32, #tpu.memory_space<vmem>>, vector<1x8xf32>
    tpu.vector_store %arg4[%c0_7, %c0_8], %11 {strides = array<i32>} : memref<1x8xf32, #tpu.memory_space<vmem>>, vector<1x8xf32>,
    return
  }
}

</mosaic_0001>

<bundles_post_ra>
// kernel: tpu_custom_call.1
= control target key start
LH: loop header
LB: loop body
LE: loop exit
PB: predicated region body
PF: predicated region fallthrough
CT: control target
= control target key end

     0   :  { %10 = vsyncpa [#allocation4], 0  ;;  %s373_s0 = inlined_call_operand.hbm [shape: f32[8,32], index: 0, kind: input, shape index: {}]   ;;  %s374_s1 = inlined_call_operand.hbm [shape: f32[32,64], index: 1, kind: input, shape index: {}]   ;;  %s375_s2 = inlined_call_operand.vmem [shape: f32[2,64], index: 2, kind: input, shape index: {}]   ;;  %s376_s3 = inlined_call_operand.<no memory space> [shape: f32[1], index: 3, kind: input, shape index: {}]   ;;  %s377_s4 = inlined_call_operand.hbm [shape: f32[1,8], index: 4, kind: output, shape index: {}]  }
   0x1   :  { %11 = vsyncpa [#allocation7], 0 }
   0x2   :  { %12 = vsyncpa [#allocation5], 0  ;;  %s326_s15 = smov [#allocation3]   ;;  %s327_s17 = smov [#allocation6]  }
   0x3   :  { %s19_s16 = sshll.u32 %s326_s15, 4  ;;  %s28_s18 = sshll.u32 %s327_s17, 4  ;;  %s20_s16 = int_to_ptr.vmem [resolvable:$true] %s19_s16  ;;  %s29_s18 = int_to_ptr.vmem [resolvable:$true] %s28_s18 }
   0x4   :  { %s268_s19 = scalar_lea.vmem %s20_s16, 128  ;;  %p273_p1 = scmp.lt.s32.totalorder %s20_s16, %s20_s16 }
   0x5   :  { %p269_p0 = scmp.ne.s32.totalorder %s20_s16, %s268_s19  ;;  %p274_p2 = scmp.lt.s32.totalorder %s268_s19, %s268_s19 }
   0x7   :  { %p275_p3 = por %p274_p2, %p273_p1 }
   0x9   :  { %p276_p4 = pnand %p275_p3, %p269_p0 }
   0xb   :  { %279 = shalt.err (!%p276_p4)
}
   0xc   :  { %22 = dma.hbm_to_vmem [thread:$0]  %s373_s0, 128, %s20_s16, [#allocation4]  }
   0xd   :  { %s288_s22 = scalar_lea.vmem %s29_s18, 512  ;;  %p293_p6 = scmp.lt.s32.totalorder %s29_s18, %s29_s18 }
   0xe   :  { %p289_p5 = scmp.ne.s32.totalorder %s29_s18, %s288_s22  ;;  %p294_p7 = scmp.lt.s32.totalorder %s288_s22, %s288_s22 }
  0x10   :  { %p295_p8 = por %p294_p7, %p293_p6 }
  0x12   :  { %p296_p9 = pnand %p295_p8, %p289_p5 }
  0x14   :  { %299 = shalt.err (!%p296_p9)
}
  0x15   :  { %s328_s23 = smov 128   ;;  %s329_s24 = smov 8  }
  0x16   :  { %34 = dma.hbm_to_vmem [thread:$0]  %s374_s1, 512, %s29_s18, [#allocation7], %s328_s23, %s328_s23, %s329_s24  }
  0x17   :  { %320 = dma.done.wait [#allocation4], 128  }
  0x18   :  { %321 = vsyncadd [#allocation4], 4294967168 }
  0x19   :  { %322 = dma.done.wait [#allocation7], 512  }
  0x1a   :  { %323 = vsyncadd [#allocation7], 4294966784  ;;  %v330_v0 = vmov 0.0   ;;  %vm331_vm0 = vmmov 0   ;;  %v49_v1 = vld [vmem:[#allocation6 + $0x18] sm:$0xff]  ;;  %v48_v2 = vld [vmem:[#allocation6 + $0x10] sm:$0xff]  ;;  %v52_v6 = vlaneseq  ;;  %v130_v15 = vstv %s376_s3 }
  0x1b   :  { %237 = vmatprep.subr.mxu0 %v330_v0  ;;  %245 = vmatprep.mubr.msk.f32.mxu0 %vm331_vm0, %v330_v0  ;;  %v47_v3 = vld [vmem:[#allocation6 + $0x8] sm:$0xff]  ;;  %v46_v4 = vld [vmem:[#allocation6] sm:$0xff]  ;;  %v45_v5 = vld [vmem:[#allocation3] sm:$0xff]  ;;  %vm56_vm1 = vcmask 261120   ;;  %vm133_vm2 = vcmask 523264   ;;  %s332_s29 = smov [#allocation8]  }
  0x1c   :  { %248 = vmatprep.subr.mxu1 %v330_v0  ;;  %250 = vmatprep.mubr.msk.f32.mxu1 %vm331_vm0, %v330_v0  ;;  %v53_v7 = vshrl.u32 %v52_v6, 7  ;;  %v50_v9 = vld [vmem:[%s375_s2] sm:$0x3]  ;;  %s217_s30 = sshll.u32 %s332_s29, 4  ;;  %vm209_vm3 = vcmask 57344   ;;  %s218_s30 = int_to_ptr.vmem [resolvable:$true] %s217_s30 }
  0x1d   :  { %238 = vmatpush3.msra.mxu0 %v49_v1  ;;  %v132_v13 = vrot.slane %v50_v9, 1  ;;  %s300_s2 = scalar_lea.vmem %s218_s30, 16  ;;  %s304_s5 = scalar_lea.vmem %s218_s30, 32 }
  0x1e   :  { %239 = vmatprep.subr.mxu0 %v330_v0  ;;  %v54_v8 = vsub.s32 0, %v53_v7  ;;  %p301_p10 = scmp.ne.s32.totalorder %s218_s30, %s300_s2  ;;  %p305_p11 = scmp.lt.s32.totalorder %s218_s30, %s218_s30 }
  0x1f   :  { %240 = vmatpush3.msra.mxu0 %v48_v2  ;;  %p306_p12 = scmp.lt.s32.totalorder %s304_s5, %s300_s2 }
  0x20   :  { %241 = vmatprep.subr.mxu0 %v330_v0  ;;  %v55_v10 = vrot.slane %v50_v9, %v54_v8 }
  0x21   :  { %242 = vmatpush3.msra.mxu0 %v47_v3  ;;  %p307_p13 = por %p306_p12, %p305_p11 }
  0x22   :  { %243 = vmatprep.subr.mxu0 %v330_v0 }
  0x23   :  { %244 = vmatpush3.msra.mxu0 %v46_v4  ;;  %p308_p0 = pnand %p307_p13, %p301_p10 }
  0x24   :  { %246 = vmatmul.mubr.msk.f32.vlgmr.msra.gmra.mxu0 %vm56_vm1, %v45_v5 }
  0xe4   :  { %v126_v11 = vpop.f32.mrf.mxu0 }
  0xe5   :  { %v127_v12 = vadd.f32 %v126_v11, %v55_v10 }
  0xe6   :  { %v247_v14 = vpop.f32.mrf.mxu0 }
  0xe7   :  { %249 = vmatpush3.xpose.msk.msra.mxu1 %vm133_vm2, %v127_v12 }
  0xea   :  { %251 = vmatmul.mubr.msk.f32.vlgmr.msra.gmra.mxu1 %vm133_vm2, %v132_v13 }
 0x1aa   :  { %v205_v16 = vpop.f32.mrf.mxu1 }
 0x1ab   :  { %v206_v17 = vadd.f32 %v205_v16, %v130_v15 }
 0x1ac   :  { %v252_v18 = vpop.f32.mrf.mxu1 }
 0x1ad   :  { %210 = vst.msk [vmem:[#allocation8] sm:$0x1] %vm209_vm3, %v206_v17 }
 0x1ae   :  { %311 = shalt.err (!%p308_p0)
}
 0x1af   :  { %220 = dma.vmem_to_hbm [thread:$0]  %s218_s30, 16, %s377_s4, [#allocation5]  }
 0x1b0   :  { %324 = dma.done.wait [#allocation5], 16  }
 0x1b1   :  { %325 = vsyncadd [#allocation5], 4294967280 }
 0x1b2   :  { %224 = vsyncpa [#allocation4], 1 }
 0x1b3   :  { %225 = vsyncpa [#allocation7], 1 }
 0x1b4   :  { %226 = vsyncpa [#allocation5], 1 }

</bundles_post_ra>
